<compile_context>
chip_gen: v7x
topology: tpu7x:2x2x1
jax: 0.10.0
libtpu: 0.0.40
codegen_flags: <defaults>
</compile_context>

<pallas_src>
import functools

import jax
import jax.numpy as jnp
from jax.experimental import pallas as pl
from jax.experimental.pallas import tpu as pltpu

_D_PAD = 128  # lane-dense padded hidden width (n_hidden = 32 -> 128)


def _mlp_kernel(x_ref, w0_ref, wmid_ref, wlast_ref, bh_ref, blast_ref, out_ref,
                *, n_mid, compute_dtype):
    """Fused 5-layer MLP, weights VMEM-resident across the batch grid.

    x_ref    : (tb, n_in)            activations at true width
    w0_ref   : (n_in, 128)           layer-0 weight (compute_dtype)
    wmid_ref : (n_mid, 128, 128)     layers 1..3 weights (compute_dtype)
    wlast_ref: (128, n_out)          last-layer weight (compute_dtype)
    bh_ref   : (n_mid + 1, 1, 128)   hidden biases (f32, padded lanes zero)
    blast_ref: (1, n_out)            output bias (f32)
    out_ref  : (tb, n_out)           output at true width
    """
    # Layer 0: true K = n_in, f32 accumulate, f32 bias/tanh epilogue.
    h = jnp.dot(x_ref[...].astype(compute_dtype), w0_ref[...],
                preferred_element_type=jnp.float32) + bh_ref[0]
    h = jnp.tanh(h)

    # Layers 1..3: (tb, 128) @ (128, 128).
    for layer in range(n_mid):
        y = jnp.dot(h.astype(compute_dtype), wmid_ref[layer],
                    preferred_element_type=jnp.float32) + bh_ref[layer + 1]
        h = jnp.tanh(y)

    # Output layer: true N = n_out, no trailing slice needed.
    out_ref[...] = (jnp.dot(h.astype(compute_dtype), wlast_ref[...],
                            preferred_element_type=jnp.float32)
                    + blast_ref[...])


def _pack_params(params, compute_dtype):
    """Pack the 5 (W, b) pairs once; weights pre-cast to compute_dtype."""
    (w0, b0) = params[0]
    mid = params[1:-1]
    (wl, bl) = params[-1]
    n_in = w0.shape[0]
    n_out = wl.shape[1]

    # Layer 0: keep true K = n_in, pad output width to 128 lanes.
    w0_p = jnp.zeros((n_in, _D_PAD), compute_dtype)
    w0_p = w0_p.at[:, :w0.shape[1]].set(w0.astype(compute_dtype))

    # Middle layers: 128x128 zero-padded stack.
    wmid = jnp.zeros((len(mid), _D_PAD, _D_PAD), compute_dtype)
    for l, (w, _) in enumerate(mid):
        wmid = wmid.at[l, :w.shape[0], :w.shape[1]].set(w.astype(compute_dtype))

    # Last layer: pad K to 128, keep true N = n_out.
    wl_p = jnp.zeros((_D_PAD, n_out), compute_dtype)
    wl_p = wl_p.at[:wl.shape[0], :].set(wl.astype(compute_dtype))

    # Hidden biases (layers 0..3) stay f32 (exact epilogue); padded lanes zero.
    bh = jnp.zeros((1 + len(mid), 1, _D_PAD), jnp.float32)
    bh = bh.at[0, 0, :b0.size].set(b0.reshape(-1).astype(jnp.float32))
    for l, (_, b) in enumerate(mid):
        bh = bh.at[l + 1, 0, :b.size].set(b.reshape(-1).astype(jnp.float32))

    blast = bl.reshape(1, -1).astype(jnp.float32)
    return w0_p, wmid, wl_p, bh, blast


def _forward(x, w0, wmid, wlast, bh, blast, *, block_batch, compute_dtype):
    B, n_in = x.shape
    n_out = wlast.shape[1]
    n_mid = wmid.shape[0]

    # Batch tile: multiple of 8, <= block_batch, and <= ceil(B/2) so the
    # "parallel" batch grid has >= 2 steps for large B (v7x: both TCs busy).
    tb = max(8, min(block_batch, ((pl.cdiv(B, 2) + 7) // 8) * 8))
    b_pad = pl.cdiv(B, tb) * tb

    x = x.astype(jnp.float32)
    if b_pad != B:
        x = jnp.pad(x, ((0, b_pad - B), (0, 0)))

    grid = (b_pad // tb,)

    flops = 2 * b_pad * (n_in * _D_PAD + n_mid * _D_PAD * _D_PAD
                         + _D_PAD * n_out)
    bytes_accessed = (x.size * x.dtype.itemsize
                      + w0.size * w0.dtype.itemsize
                      + wmid.size * wmid.dtype.itemsize
                      + wlast.size * wlast.dtype.itemsize
                      + (bh.size + blast.size) * 4
                      + b_pad * n_out * 4)
    cost = pl.CostEstimate(flops=flops,
                           transcendentals=(1 + n_mid) * b_pad * _D_PAD,
                           bytes_accessed=bytes_accessed)

    out = pl.pallas_call(
        functools.partial(_mlp_kernel, n_mid=n_mid,
                          compute_dtype=compute_dtype),
        out_shape=jax.ShapeDtypeStruct((b_pad, n_out), jnp.float32),
        grid=grid,
        in_specs=[
            # Streaming batch tiles of activations at true feature width.
            pl.BlockSpec((tb, n_in), lambda i: (i, 0)),
            # Weights / biases: same block every step -> VMEM-resident.
            pl.BlockSpec((n_in, _D_PAD), lambda i: (0, 0)),
            pl.BlockSpec((n_mid, _D_PAD, _D_PAD), lambda i: (0, 0, 0)),
            pl.BlockSpec((_D_PAD, n_out), lambda i: (0, 0)),
            pl.BlockSpec((n_mid + 1, 1, _D_PAD), lambda i: (0, 0, 0)),
            pl.BlockSpec((1, n_out), lambda i: (0, 0)),
        ],
        out_specs=pl.BlockSpec((tb, n_out), lambda i: (i, 0)),
        compiler_params=pltpu.CompilerParams(
            dimension_semantics=("parallel",)),  # shards batch over TCs on v7x
        cost_estimate=cost,
    )(x, w0, wmid, wlast, bh, blast)

    return out[:B] if b_pad != B else out


def make_lift_net_forward(params, *, block_batch=1024,
                          compute_dtype=jnp.bfloat16):
    """Pack params once and return a jitted forward: x (B, n_in) -> (B, n_out)."""
    packed = _pack_params(params, compute_dtype)
    fwd = jax.jit(functools.partial(_forward, block_batch=block_batch,
                                    compute_dtype=compute_dtype))

    def forward(x):
        return fwd(x, *packed)

    return forward


def init_lift_net_params(key, n_input, n_hidden, n_output):
    """Deterministic init matching the PyTorch module:
    weights ~ Normal(0, 0.1), biases = 0.  W stored as (in, out)."""
    dims = [(n_input, n_hidden),
            (n_hidden, n_hidden),
            (n_hidden, n_hidden),
            (n_hidden, n_hidden),
            (n_hidden, n_output)]
    params = []
    for (d_in, d_out) in dims:
        key, sub = jax.random.split(key)
        w = 0.1 * jax.random.normal(sub, (d_in, d_out), dtype=jnp.float32)
        b = jnp.zeros((1, d_out), dtype=jnp.float32)
        params.append((w, b))
    return params


def lift_net_reference(x, params):
    """Pure-JAX reference for correctness checking."""
    h = x
    for i, (w, b) in enumerate(params):
        h = h @ w + b
        if i < len(params) - 1:
            h = jnp.tanh(h)
    return h


if __name__ == "__main__":
    # Shapes from the module: n_input = 4, n_hidden = 32, n_output = lift_d = 19.
    n_input, n_hidden, n_output = 4, 32, 19

    key = jax.random.PRNGKey(0)
    key, xkey = jax.random.split(key)
    params = init_lift_net_params(key, n_input, n_hidden, n_output)

    # --- f32 compute path, tight tolerance, single grid step ---
    fwd_f32 = make_lift_net_forward(params, block_batch=64,
                                    compute_dtype=jnp.float32)
    B = 8
    x = jax.random.normal(xkey, (B, n_input), dtype=jnp.float32)
    out = jax.block_until_ready(fwd_f32(x))
    ref = lift_net_reference(x, params)
    assert out.shape == (B, n_output)
    assert jnp.allclose(out, ref, atol=1e-5, rtol=1e-5), "f32 mismatch (B=8)"

    # --- larger batch: multi-step grid + batch padding, f32 ---
    key, xkey2 = jax.random.split(key)
    B2 = 200
    x2 = jax.random.normal(xkey2, (B2, n_input), dtype=jnp.float32)
    out2 = jax.block_until_ready(fwd_f32(x2))
    ref2 = lift_net_reference(x2, params)
    assert out2.shape == (B2, n_output)
    assert jnp.allclose(out2, ref2, atol=1e-5, rtol=1e-5), "f32 mismatch (B=200)"

    # --- default bf16 MXU path (f32 accumulate + f32 bias/tanh epilogue) ---
    fwd_bf16 = make_lift_net_forward(params)
    out_bf = jax.block_until_ready(fwd_bf16(x2))
    assert out_bf.shape == (B2, n_output)
    assert jnp.allclose(out_bf, ref2, atol=5e-2, rtol=5e-2), "bf16 mismatch"

    print("KERNEL_OK")
</pallas_src>

<mosaic_0001>
module attributes {stable_mosaic.version = 11 : i64} {
  func.func @_mlp_kernel(%arg0: i32, %arg1: memref<8x4xf32, #tpu.memory_space<vmem>>, %arg2: memref<4x128xf32, #tpu.memory_space<vmem>>, %arg3: memref<3x128x128xf32, #tpu.memory_space<vmem>>, %arg4: memref<128x19xf32, #tpu.memory_space<vmem>>, %arg5: memref<4x1x128xf32, #tpu.memory_space<vmem>>, %arg6: memref<1x19xf32, #tpu.memory_space<vmem>>, %arg7: memref<8x19xf32, #tpu.memory_space<vmem>>) attributes {dimension_semantics = [#tpu.dimension_semantics<parallel>], iteration_bounds = array<i64: 1>, scalar_prefetch = 0 : i64, scratch_operands = 0 : i64, tpu.core_type = #tpu.core_type<tc>, window_params = [{transform_indices = @transform_0, window_bounds = array<i64: 8, 4>}, {pipeline_mode = #tpu.pipeline_mode<synchronous>, transform_indices = @transform_1, window_bounds = array<i64: 4, 128>}, {pipeline_mode = #tpu.pipeline_mode<synchronous>, transform_indices = @transform_2, window_bounds = array<i64: 3, 128, 128>}, {pipeline_mode = #tpu.pipeline_mode<synchronous>, transform_indices = @transform_3, window_bounds = array<i64: 128, 19>}, {pipeline_mode = #tpu.pipeline_mode<synchronous>, transform_indices = @transform_4, window_bounds = array<i64: 4, 1, 128>}, {pipeline_mode = #tpu.pipeline_mode<synchronous>, transform_indices = @transform_5, window_bounds = array<i64: 1, 19>}, {transform_indices = @transform_6, window_bounds = array<i64: 8, 19>}]} {
    %c0 = arith.constant 0 : index
    %c0_0 = arith.constant 0 : index
    %0 = vector.load %arg1[%c0, %c0_0] : memref<8x4xf32, #tpu.memory_space<vmem>>, vector<8x4xf32>
    %c0_1 = arith.constant 0 : index
    %c0_2 = arith.constant 0 : index
    %1 = vector.load %arg2[%c0_1, %c0_2] : memref<4x128xf32, #tpu.memory_space<vmem>>, vector<4x128xf32>
    %cst = arith.constant dense<0.000000e+00> : vector<8x128xf32>
    %2 = tpu.matmul %0, %1, %cst {dimension_numbers = #tpu.dot_dimension_numbers<[1], [0], [0], [1], [0, 0, 1, 1], [], []>} : vector<8x4xf32>, vector<4x128xf32>, vector<8x128xf32> -> vector<8x128xf32>
    %c0_3 = arith.constant 0 : index
    %c0_4 = arith.constant 0 : index
    %c0_5 = arith.constant 0 : index
    %3 = vector.load %arg5[%c0_3, %c0_4, %c0_5] : memref<4x1x128xf32, #tpu.memory_space<vmem>>, vector<1x1x128xf32>
    %4 = vector.shape_cast %3 : vector<1x1x128xf32> to vector<1x128xf32>
    %5 = vector.broadcast %4 : vector<1x128xf32> to vector<8x128xf32>
    %6 = arith.addf %2, %5 : vector<8x128xf32>
    %7 = math.tanh %6 : vector<8x128xf32>
    %c0_6 = arith.constant 0 : index
    %c0_7 = arith.constant 0 : index
    %c0_8 = arith.constant 0 : index
    %8 = vector.load %arg3[%c0_6, %c0_7, %c0_8] : memref<3x128x128xf32, #tpu.memory_space<vmem>>, vector<1x128x128xf32>
    %9 = vector.shape_cast %8 : vector<1x128x128xf32> to vector<128x128xf32>
    %cst_9 = arith.constant dense<0.000000e+00> : vector<8x128xf32>
    %10 = tpu.matmul %7, %9, %cst_9 {dimension_numbers = #tpu.dot_dimension_numbers<[1], [0], [0], [1], [0, 0, 1, 1], [], []>} : vector<8x128xf32>, vector<128x128xf32>, vector<8x128xf32> -> vector<8x128xf32>
    %c1 = arith.constant 1 : index
    %c0_10 = arith.constant 0 : index
    %c0_11 = arith.constant 0 : index
    %11 = vector.load %arg5[%c1, %c0_10, %c0_11] : memref<4x1x128xf32, #tpu.memory_space<vmem>>, vector<1x1x128xf32>
    %12 = vector.shape_cast %11 : vector<1x1x128xf32> to vector<1x128xf32>
    %13 = vector.broadcast %12 : vector<1x128xf32> to vector<8x128xf32>
    %14 = arith.addf %10, %13 : vector<8x128xf32>
    %15 = math.tanh %14 : vector<8x128xf32>
    %c1_12 = arith.constant 1 : index
    %c0_13 = arith.constant 0 : index
    %c0_14 = arith.constant 0 : index
    %16 = vector.load %arg3[%c1_12, %c0_13, %c0_14] : memref<3x128x128xf32, #tpu.memory_space<vmem>>, vector<1x128x128xf32>
    %17 = vector.shape_cast %16 : vector<1x128x128xf32> to vector<128x128xf32>
    %cst_15 = arith.constant dense<0.000000e+00> : vector<8x128xf32>
    %18 = tpu.matmul %15, %17, %cst_15 {dimension_numbers = #tpu.dot_dimension_numbers<[1], [0], [0], [1], [0, 0, 1, 1], [], []>} : vector<8x128xf32>, vector<128x128xf32>, vector<8x128xf32> -> vector<8x128xf32>
    %c2 = arith.constant 2 : index
    %c0_16 = arith.constant 0 : index
    %c0_17 = arith.constant 0 : index
    %19 = vector.load %arg5[%c2, %c0_16, %c0_17] : memref<4x1x128xf32, #tpu.memory_space<vmem>>, vector<1x1x128xf32>
    %20 = vector.shape_cast %19 : vector<1x1x128xf32> to vector<1x128xf32>
    %21 = vector.broadcast %20 : vector<1x128xf32> to vector<8x128xf32>
    %22 = arith.addf %18, %21 : vector<8x128xf32>
    %23 = math.tanh %22 : vector<8x128xf32>
    %c2_18 = arith.constant 2 : index
    %c0_19 = arith.constant 0 : index
    %c0_20 = arith.constant 0 : index
    %24 = vector.load %arg3[%c2_18, %c0_19, %c0_20] : memref<3x128x128xf32, #tpu.memory_space<vmem>>, vector<1x128x128xf32>
    %25 = vector.shape_cast %24 : vector<1x128x128xf32> to vector<128x128xf32>
    %cst_21 = arith.constant dense<0.000000e+00> : vector<8x128xf32>
    %26 = tpu.matmul %23, %25, %cst_21 {dimension_numbers = #tpu.dot_dimension_numbers<[1], [0], [0], [1], [0, 0, 1, 1], [], []>} : vector<8x128xf32>, vector<128x128xf32>, vector<8x128xf32> -> vector<8x128xf32>
    %c3 = arith.constant 3 : index
    %c0_22 = arith.constant 0 : index
    %c0_23 = arith.constant 0 : index
    %27 = vector.load %arg5[%c3, %c0_22, %c0_23] : memref<4x1x128xf32, #tpu.memory_space<vmem>>, vector<1x1x128xf32>
    %28 = vector.shape_cast %27 : vector<1x1x128xf32> to vector<1x128xf32>
    %29 = vector.broadcast %28 : vector<1x128xf32> to vector<8x128xf32>
    %30 = arith.addf %26, %29 : vector<8x128xf32>
    %31 = math.tanh %30 : vector<8x128xf32>
    %c0_24 = arith.constant 0 : index
    %c0_25 = arith.constant 0 : index
    %32 = vector.load %arg4[%c0_24, %c0_25] : memref<128x19xf32, #tpu.memory_space<vmem>>, vector<128x19xf32>
    %cst_26 = arith.constant dense<0.000000e+00> : vector<8x19xf32>
    %33 = tpu.matmul %31, %32, %cst_26 {dimension_numbers = #tpu.dot_dimension_numbers<[1], [0], [0], [1], [0, 0, 1, 1], [], []>} : vector<8x128xf32>, vector<128x19xf32>, vector<8x19xf32> -> vector<8x19xf32>
    %c0_27 = arith.constant 0 : index
    %c0_28 = arith.constant 0 : index
    %34 = vector.load %arg6[%c0_27, %c0_28] : memref<1x19xf32, #tpu.memory_space<vmem>>, vector<1x19xf32>
    %35 = vector.broadcast %34 : vector<1x19xf32> to vector<8x19xf32>
    %36 = arith.addf %33, %35 : vector<8x19xf32>
    %c0_29 = arith.constant 0 : index
    %c0_30 = arith.constant 0 : index
    %37 = vector.load %arg7[%c0_29, %c0_30] : memref<8x19xf32, #tpu.memory_space<vmem>>, vector<8x19xf32>
    tpu.vector_store %arg7[%c0_29, %c0_30], %36 {strides = array<i32>} : memref<8x19xf32, #tpu.memory_space<vmem>>, vector<8x19xf32>,
    return
  }
  func.func @transform_0(%arg0: i32) -> (i32, i32) {
    %c0_i32 = arith.constant 0 : i32
    %c0_i32_0 = arith.constant 0 : i32
    return %arg0, %c0_i32 : i32, i32
  }
  func.func @transform_1(%arg0: i32) -> (i32, i32) {
    %c0_i32 = arith.constant 0 : i32
    %c0_i32_0 = arith.constant 0 : i32
    %c0_i32_1 = arith.constant 0 : i32
    return %c0_i32, %c0_i32_0 : i32, i32
  }
  func.func @transform_2(%arg0: i32) -> (i32, i32, i32) {
    %c0_i32 = arith.constant 0 : i32
    %c0_i32_0 = arith.constant 0 : i32
    %c0_i32_1 = arith.constant 0 : i32
    %c0_i32_2 = arith.constant 0 : i32
    return %c0_i32, %c0_i32_0, %c0_i32_1 : i32, i32, i32
  }
  func.func @transform_3(%arg0: i32) -> (i32, i32) {
    %c0_i32 = arith.constant 0 : i32
    %c0_i32_0 = arith.constant 0 : i32
    %c0_i32_1 = arith.constant 0 : i32
    return %c0_i32, %c0_i32_0 : i32, i32
  }
  func.func @transform_4(%arg0: i32) -> (i32, i32, i32) {
    %c0_i32 = arith.constant 0 : i32
    %c0_i32_0 = arith.constant 0 : i32
    %c0_i32_1 = arith.constant 0 : i32
    %c0_i32_2 = arith.constant 0 : i32
    return %c0_i32, %c0_i32_0, %c0_i32_1 : i32, i32, i32
  }
  func.func @transform_5(%arg0: i32) -> (i32, i32) {
    %c0_i32 = arith.constant 0 : i32
    %c0_i32_0 = arith.constant 0 : i32
    %c0_i32_1 = arith.constant 0 : i32
    return %c0_i32, %c0_i32_0 : i32, i32
  }
  func.func @transform_6(%arg0: i32) -> (i32, i32) {
    %c0_i32 = arith.constant 0 : i32
    %c0_i32_0 = arith.constant 0 : i32
    return %arg0, %c0_i32 : i32, i32
  }
}

</mosaic_0001>

<bundles_post_ra>
// kernel: _forward.1
= control target key start
LH: loop header
LB: loop body
LE: loop exit
PB: predicated region body
PF: predicated region fallthrough
CT: control target
= control target key end

     0   :  { %11 = vsyncpa [#allocation3], 0  ;;  %s1085_s0 = inlined_call_operand.vmem [shape: f32[8,4], index: 0, kind: input, shape index: {}]   ;;  %s1086_s1 = inlined_call_operand.vmem [shape: f32[4,128], index: 1, kind: input, shape index: {}]   ;;  %s1087_s2 = inlined_call_operand.hbm [shape: f32[3,128,128], index: 2, kind: input, shape index: {}]   ;;  %s1088_s3 = inlined_call_operand.vmem [shape: f32[128,19], index: 3, kind: input, shape index: {}]   ;;  %s1089_s4 = inlined_call_operand.vmem [shape: f32[4,1,128], index: 4, kind: input, shape index: {}]   ;;  %s1090_s5 = inlined_call_operand.vmem [shape: f32[1,19], index: 5, kind: input, shape index: {}]   ;;  %s1091_s6 = inlined_call_operand.hbm [shape: f32[8,19], index: 6, kind: output, shape index: {}]  }
   0x1   :  { %12 = vsyncpa [#allocation4], 0  ;;  %s907_s21 = smov [#allocation2]   ;;  %s859_s25 = scalar_lea.hbm %s1087_s2, 6144 }
   0x2   :  { %s22_s22 = sshll.u32 %s907_s21, 4  ;;  %p860_p0 = scmp.ne.s32.totalorder %s1087_s2, %s859_s25  ;;  %s23_s22 = int_to_ptr.vmem [resolvable:$true] %s22_s22 }
   0x3   :  { %p863_p1 = scmp.lt.u32.totalorder %s859_s25, %s1087_s2 }
   0x5   :  { %p865_p2 = pnand %p863_p1, %p860_p0 }
   0x7   :  { %868 = shalt.err (!%p865_p2)
}
   0x8   :  { %s869_s30 = scalar_lea.vmem %s23_s22, 6144  ;;  %p874_p4 = scmp.lt.s32.totalorder %s23_s22, %s23_s22 }
   0x9   :  { %p870_p3 = scmp.ne.s32.totalorder %s23_s22, %s869_s30  ;;  %p875_p5 = scmp.lt.s32.totalorder %s869_s30, %s869_s30 }
   0xb   :  { %p876_p6 = por %p875_p5, %p874_p4 }
   0xd   :  { %p877_p7 = pnand %p876_p6, %p870_p3 }
   0xf   :  { %880 = shalt.err (!%p877_p7)
}
  0x10   :  { %s908_s7 = smov 128   ;;  %s909_s8 = smov 8  }
  0x11   :  { %28 = dma.hbm_to_vmem [thread:$0]  %s1087_s2, 6144, %s23_s22, [#allocation3], %s908_s7, %s908_s7, %s909_s8  }
  0x12   :  { %903 = dma.done.wait [#allocation3], 6144  }
  0x13   :  { %904 = vsyncadd [#allocation3], 4294961152  ;;  %v910_v0 = vmov 0.0   ;;  %vm911_vm0 = vmmov 0   ;;  %v912_v1 = vmov 0.0|0.0   ;;  %vm51_vm1 = vcmask 1043456  }
  0x14   :  { %603 = vmatprep.subr.mxu0 %v910_v0  ;;  %605 = vmatprep.mubr.msk.f32.mxu0 %vm911_vm0, %v910_v0  ;;  %vm47_vm2 = vcmask 31744   ;;  %v39_v2 = vld [vmem:[%s1086_s1] sm:$0xf]  ;;  %v126_v4 = vld [vmem:[#allocation2] sm:$0xff]  ;;  %v127_v5 = vld [vmem:[#allocation2 + $0x8] sm:$0xff]  ;;  %vm506_vm3 = vcmask 154624  }
  0x15   :  { %748 = vmatprep.subr.bf16.mxu1 %v912_v1  ;;  %640 = vmatprep.mubr.msk.f32.mxu1 %vm911_vm0, %v910_v0  ;;  %v38_v3 = vld [vmem:[%s1085_s0] sm:$0xff]  ;;  %v128_v6 = vld [vmem:[#allocation2 + $0x10] sm:$0xff]  ;;  %v749_v8 = vpack.c.bf16 %v127_v5, %v126_v4  ;;  %v130_v10 = vld [vmem:[#allocation2 + $0x20] sm:$0xff] }
  0x16   :  { %604 = vmatpush3.msk.msra.mxu0 %vm51_vm1, %v39_v2  ;;  %v129_v7 = vld [vmem:[#allocation2 + $0x18] sm:$0xff]  ;;  %v131_v11 = vld [vmem:[#allocation2 + $0x28] sm:$0xff]  ;;  %v132_v13 = vld [vmem:[#allocation2 + $0x30] sm:$0xff] }
  0x17   :  { %606 = vmatmul.mubr.msk.f32.vlgmr.msra.gmra.mrb[0].mxu0 %vm47_vm2, %v38_v3  ;;  %772 = vmatprep.subr.bf16.mxu0 %v912_v1  ;;  %v752_v9 = vpack.c.bf16 %v129_v7, %v128_v6  ;;  %v755_v12 = vpack.c.bf16 %v131_v11, %v130_v10  ;;  %v133_v14 = vld [vmem:[#allocation2 + $0x38] sm:$0xff]  ;;  %v134_v16 = vld [vmem:[#allocation2 + $0x40] sm:$0xff]  ;;  %v135_v17 = vld [vmem:[#allocation2 + $0x48] sm:$0xff] }
  0x18   :  { %675 = vmatprep.mubr.msk.f32.mxu0 %vm911_vm0, %v910_v0  ;;  %750 = vmatpush3.bf16.msra.mxu1 %v749_v8  ;;  %v758_v15 = vpack.c.bf16 %v133_v14, %v132_v13  ;;  %v761_v18 = vpack.c.bf16 %v135_v17, %v134_v16  ;;  %v136_v19 = vld [vmem:[#allocation2 + $0x50] sm:$0xff]  ;;  %v137_v20 = vld [vmem:[#allocation2 + $0x58] sm:$0xff]  ;;  %v138_v22 = vld [vmem:[#allocation2 + $0x60] sm:$0xff] }
  0x19   :  { %751 = vmatprep.subr.bf16.mxu1 %v912_v1  ;;  %v764_v21 = vpack.c.bf16 %v137_v20, %v136_v19  ;;  %v139_v23 = vld [vmem:[#allocation2 + $0x68] sm:$0xff]  ;;  %v140_v25 = vld [vmem:[#allocation2 + $0x70] sm:$0xff]  ;;  %v141_v26 = vld [vmem:[#allocation2 + $0x78] sm:$0xff] }
  0x1a   :  { %v767_v24 = vpack.c.bf16 %v139_v23, %v138_v22  ;;  %v770_v27 = vpack.c.bf16 %v141_v26, %v140_v25  ;;  %v222_v28 = vld [vmem:[#allocation2 + $0x80] sm:$0xff]  ;;  %v223_v29 = vld [vmem:[#allocation2 + $0x88] sm:$0xff]  ;;  %v224_v30 = vld [vmem:[#allocation2 + $0x90] sm:$0xff] }
  0x1b   :  { %v773_v31 = vpack.c.bf16 %v223_v29, %v222_v28  ;;  %v225_v32 = vld [vmem:[#allocation2 + $0x98] sm:$0xff]  ;;  %v226_v34 = vld [vmem:[#allocation2 + $0xa0] sm:$0xff]  ;;  %v227_v35 = vld [vmem:[#allocation2 + $0xa8] sm:$0xff] }
  0x1c   :  { %753 = vmatpush3.bf16.msra.mxu1 %v752_v9  ;;  %v776_v33 = vpack.c.bf16 %v225_v32, %v224_v30  ;;  %v779_v36 = vpack.c.bf16 %v227_v35, %v226_v34  ;;  %v228_v37 = vld [vmem:[#allocation2 + $0xb0] sm:$0xff]  ;;  %v229_v38 = vld [vmem:[#allocation2 + $0xb8] sm:$0xff]  ;;  %v230_v40 = vld [vmem:[#allocation2 + $0xc0] sm:$0xff] }
  0x1d   :  { %754 = vmatprep.subr.bf16.mxu1 %v912_v1  ;;  %774 = vmatpush3.bf16.msra.mxu0 %v773_v31  ;;  %v782_v39 = vpack.c.bf16 %v229_v38, %v228_v37  ;;  %v231_v41 = vld [vmem:[#allocation2 + $0xc8] sm:$0xff]  ;;  %v523_v43 = vld [vmem:[%s1089_s4] ss:$0 sm:$0xff]  ;;  %v232_v48 = vld [vmem:[#allocation2 + $0xd0] sm:$0xff] }
  0x1e   :  { %775 = vmatprep.subr.bf16.mxu0 %v912_v1  ;;  %v785_v42 = vpack.c.bf16 %v231_v41, %v230_v40  ;;  %v233_v49 = vld [vmem:[#allocation2 + $0xd8] sm:$0xff]  ;;  %v234_v51 = vld [vmem:[#allocation2 + $0xe0] sm:$0xff]  ;;  %v235_v52 = vld [vmem:[#allocation2 + $0xe8] sm:$0xff] }
  0x1f   :  { %v788_v50 = vpack.c.bf16 %v233_v49, %v232_v48  ;;  %v791_v53 = vpack.c.bf16 %v235_v52, %v234_v51  ;;  %v236_v54 = vld [vmem:[#allocation2 + $0xf0] sm:$0xff]  ;;  %v237_v55 = vld [vmem:[#allocation2 + $0xf8] sm:$0xff]  ;;  %v318_v57 = vld [vmem:[#allocation2 + $0x100] sm:$0xff] }
  0x20   :  { %756 = vmatpush3.bf16.msra.mxu1 %v755_v12  ;;  %v794_v56 = vpack.c.bf16 %v237_v55, %v236_v54  ;;  %v319_v58 = vld [vmem:[#allocation2 + $0x108] sm:$0xff]  ;;  %v320_v59 = vld [vmem:[#allocation2 + $0x110] sm:$0xff]  ;;  %v321_v61 = vld [vmem:[#allocation2 + $0x118] sm:$0xff] }
  0x21   :  { %757 = vmatprep.subr.bf16.mxu1 %v912_v1  ;;  %777 = vmatpush3.bf16.msra.mxu0 %v776_v33  ;;  %v797_v60 = vpack.c.bf16 %v319_v58, %v318_v57  ;;  %v800_v62 = vpack.c.bf16 %v321_v61, %v320_v59  ;;  %v322_v63 = vld [vmem:[#allocation2 + $0x120] sm:$0xff]  ;;  %v323_v2 = vld [vmem:[#allocation2 + $0x128] sm:$0xff]  ;;  %v324_v4 = vld [vmem:[#allocation2 + $0x130] sm:$0xff] }
  0x22   :  { %778 = vmatprep.subr.bf16.mxu0 %v912_v1  ;;  %v803_v3 = vpack.c.bf16 %v323_v2, %v322_v63  ;;  %v325_v5 = vld [vmem:[#allocation2 + $0x138] sm:$0xff]  ;;  %v326_v7 = vld [vmem:[#allocation2 + $0x140] sm:$0xff]  ;;  %v327_v8 = vld [vmem:[#allocation2 + $0x148] sm:$0xff] }
  0x23   :  { %v806_v6 = vpack.c.bf16 %v325_v5, %v324_v4  ;;  %v809_v9 = vpack.c.bf16 %v327_v8, %v326_v7  ;;  %v527_v10 = vld [vmem:[%s1089_s4 + $0x1] ss:$0 sm:$0xff]  ;;  %v331_v19 = vld [vmem:[#allocation2 + $0x168] sm:$0xff]  ;;  %v418_v30 = vld [vmem:[%s1088_s3 + $0x28] sm:$0xff] }
  0x24   :  { %759 = vmatpush3.bf16.msra.mxu1 %v758_v15  ;;  %v328_v15 = vld [vmem:[#allocation2 + $0x150] sm:$0xff]  ;;  %v329_v16 = vld [vmem:[#allocation2 + $0x158] sm:$0xff]  ;;  %v415_v25 = vld [vmem:[%s1088_s3 + $0x10] sm:$0xff] }
  0x25   :  { %760 = vmatprep.subr.bf16.mxu1 %v912_v1  ;;  %780 = vmatpush3.bf16.msra.mxu0 %v779_v36  ;;  %v812_v17 = vpack.c.bf16 %v329_v16, %v328_v15  ;;  %v333_v22 = vld [vmem:[#allocation2 + $0x178] sm:$0xff]  ;;  %v419_v32 = vld [vmem:[%s1088_s3 + $0x30] sm:$0xff]  ;;  %v420_v33 = vld [vmem:[%s1088_s3 + $0x38] sm:$0xff] }
  0x26   :  { %781 = vmatprep.subr.bf16.mxu0 %v912_v1  ;;  %v417_v29 = vld [vmem:[%s1088_s3 + $0x20] sm:$0xff]  ;;  %v830_v34 = vpack.c.bf16 %v420_v33, %v419_v32  ;;  %v422_v36 = vld [vmem:[%s1088_s3 + $0x48] sm:$0xff]  ;;  %v427_v49 = vld [vmem:[%s1088_s3 + $0x70] sm:$0xff] }
  0x27   :  { %v827_v31 = vpack.c.bf16 %v418_v30, %v417_v29  ;;  %v421_v35 = vld [vmem:[%s1088_s3 + $0x40] sm:$0xff] }
  0x28   :  { %762 = vmatpush3.bf16.msra.mxu1 %v761_v18  ;;  %v330_v18 = vld [vmem:[#allocation2 + $0x160] sm:$0xff]  ;;  %v833_v37 = vpack.c.bf16 %v422_v36, %v421_v35  ;;  %v529_v38 = vld [vmem:[%s1089_s4 + $0x2] ss:$0 sm:$0xff]  ;;  %v531_v52 = vld [vmem:[%s1089_s4 + $0x3] ss:$0 sm:$0xff] }
  0x29   :  { %763 = vmatprep.subr.bf16.mxu1 %v912_v1  ;;  %783 = vmatpush3.bf16.msra.mxu0 %v782_v39  ;;  %v815_v20 = vpack.c.bf16 %v331_v19, %v330_v18  ;;  %v532_v57 = vld [vmem:[%s1090_s5] ss:$0 sm:$0xff] }
  0x2a   :  { %784 = vmatprep.subr.bf16.mxu0 %v912_v1 }
  0x2c   :  { %765 = vmatpush3.bf16.msra.mxu1 %v764_v21  ;;  %v332_v21 = vld [vmem:[#allocation2 + $0x170] sm:$0xff] }
  0x2d   :  { %766 = vmatprep.subr.bf16.mxu1 %v912_v1  ;;  %786 = vmatpush3.bf16.msra.mxu0 %v785_v42  ;;  %v818_v23 = vpack.c.bf16 %v333_v22, %v332_v21 }
  0x2e   :  { %787 = vmatprep.subr.bf16.mxu0 %v912_v1 }
  0x30   :  { %768 = vmatpush3.bf16.msra.mxu1 %v767_v24  ;;  %v414_v24 = vld [vmem:[%s1088_s3 + $0x8] sm:$0xff] }
  0x31   :  { %769 = vmatprep.subr.bf16.mxu1 %v912_v1  ;;  %789 = vmatpush3.bf16.msra.mxu0 %v788_v50  ;;  %v428_v50 = vld [vmem:[%s1088_s3 + $0x78] sm:$0xff] }
  0x32   :  { %790 = vmatprep.subr.bf16.mxu0 %v912_v1  ;;  %v842_v51 = vpack.c.bf16 %v428_v50, %v427_v49 }
  0x34   :  { %771 = vmatpush3.bf16.msra.mxu1 %v770_v27  ;;  %v416_v27 = vld [vmem:[%s1088_s3 + $0x18] sm:$0xff] }
  0x35   :  { %796 = vmatprep.subr.bf16.mxu1 %v912_v1  ;;  %792 = vmatpush3.bf16.msra.mxu0 %v791_v53  ;;  %v824_v28 = vpack.c.bf16 %v416_v27, %v415_v25 }
  0x36   :  { %793 = vmatprep.subr.bf16.mxu0 %v912_v1 }
  0x39   :  { %795 = vmatpush3.bf16.msra.mxu0 %v794_v56 }
  0x3a   :  { %820 = vmatprep.subr.bf16.mxu0 %v912_v1 }
  0xea   :  { %v121_v44 = vpop.f32.mrb[0].mxu0 }
  0xeb   :  { %v122_v45 = vadd.f32 %v523_v43, %v121_v44  ;;  %v607_v46 = vpop.f32.mrb[1].mxu0  ;;  %v423_v43 = vld [vmem:[%s1088_s3 + $0x50] sm:$0xff]  ;;  %v424_v44 = vld [vmem:[%s1088_s3 + $0x58] sm:$0xff] }
  0xec   :  { %v425_v46 = vld [vmem:[%s1088_s3 + $0x60] sm:$0xff] }
  0xed   :  { %851 = vtanh.f32 %v122_v45  ;;  %v836_v45 = vpack.c.bf16 %v424_v44, %v423_v43 }
  0xf7   :  { %v852_v47 = vpop.eup %851 }
  0xf8   :  { %641 = vmatmul.mubr.f32.vlgmr.msra.gmra.mrb[0].mxu1 %v852_v47  ;;  %v426_v47 = vld [vmem:[%s1088_s3 + $0x68] sm:$0xff] }
  0xf9   :  { %710 = vmatprep.mubr.msk.f32.mxu1 %vm911_vm0, %v910_v0  ;;  %798 = vmatpush3.bf16.msra.mxu1 %v797_v60  ;;  %v839_v48 = vpack.c.bf16 %v426_v47, %v425_v46 }
  0xfa   :  { %799 = vmatprep.subr.bf16.mxu1 %v912_v1 }
  0xfd   :  { %801 = vmatpush3.bf16.msra.mxu1 %v800_v62 }
  0xfe   :  { %802 = vmatprep.subr.bf16.mxu1 %v912_v1 }
 0x101   :  { %804 = vmatpush3.bf16.msra.mxu1 %v803_v3 }
 0x102   :  { %805 = vmatprep.subr.bf16.mxu1 %v912_v1 }
 0x105   :  { %807 = vmatpush3.bf16.msra.mxu1 %v806_v6 }
 0x106   :  { %808 = vmatprep.subr.bf16.mxu1 %v912_v1 }
 0x109   :  { %810 = vmatpush3.bf16.msra.mxu1 %v809_v9 }
 0x10a   :  { %811 = vmatprep.subr.bf16.mxu1 %v912_v1 }
 0x10d   :  { %813 = vmatpush3.bf16.msra.mxu1 %v812_v17 }
 0x10e   :  { %814 = vmatprep.subr.bf16.mxu1 %v912_v1 }
 0x111   :  { %816 = vmatpush3.bf16.msra.mxu1 %v815_v20 }
 0x112   :  { %817 = vmatprep.subr.bf16.mxu1 %v912_v1 }
 0x115   :  { %819 = vmatpush3.bf16.msra.mxu1 %v818_v23 }
 0x1cb   :  { %v216_v11 = vpop.f32.mrb[0].mxu1 }
 0x1cc   :  { %v217_v12 = vadd.f32 %v527_v10, %v216_v11  ;;  %v642_v13 = vpop.f32.mrb[1].mxu1 }
 0x1ce   :  { %853 = vtanh.f32 %v217_v12 }
 0x1d8   :  { %v854_v14 = vpop.eup %853 }
 0x1d9   :  { %676 = vmatmul.mubr.f32.vlgmr.msra.gmra.mrb[2].mxu0 %v854_v14 }
 0x1da   :  { %745 = vmatprep.mubr.msk.f32.mxu0 %vm911_vm0, %v910_v0  ;;  %v413_v0 = vld [vmem:[%s1088_s3] sm:$0xff]  ;;  %s913_s3 = smov [#allocation5]  }
 0x1db   :  { %v821_v26 = vpack.c.bf16 %v414_v24, %v413_v0  ;;  %s514_s27 = sshll.u32 %s913_s3, 4  ;;  %s515_s27 = int_to_ptr.vmem [resolvable:$true] %s514_s27 }
 0x1dc   :  { %s881_s28 = scalar_lea.vmem %s515_s27, 128  ;;  %p886_p9 = scmp.lt.s32.totalorder %s515_s27, %s515_s27 }
 0x1dd   :  { %822 = vmatpush3.bf16.msra.mxu0 %v821_v26  ;;  %p882_p8 = scmp.ne.s32.totalorder %s515_s27, %s881_s28  ;;  %p887_p10 = scmp.lt.s32.totalorder %s881_s28, %s881_s28 }
 0x1de   :  { %823 = vmatprep.subr.bf16.mxu0 %v912_v1 }
 0x1df   :  { %p888_p11 = por %p887_p10, %p886_p9 }
 0x1e1   :  { %825 = vmatpush3.bf16.msra.mxu0 %v824_v28  ;;  %p889_p12 = pnand %p888_p11, %p882_p8 }
 0x1e2   :  { %826 = vmatprep.subr.bf16.mxu0 %v912_v1 }
 0x1e5   :  { %828 = vmatpush3.bf16.msra.mxu0 %v827_v31 }
 0x1e6   :  { %829 = vmatprep.subr.bf16.mxu0 %v912_v1 }
 0x1e9   :  { %831 = vmatpush3.bf16.msra.mxu0 %v830_v34 }
 0x1ea   :  { %832 = vmatprep.subr.bf16.mxu0 %v912_v1 }
 0x1ed   :  { %834 = vmatpush3.bf16.msra.mxu0 %v833_v37 }
 0x1ee   :  { %835 = vmatprep.subr.bf16.mxu0 %v912_v1 }
 0x1f1   :  { %837 = vmatpush3.bf16.msra.mxu0 %v836_v45 }
 0x1f2   :  { %838 = vmatprep.subr.bf16.mxu0 %v912_v1 }
 0x1f5   :  { %840 = vmatpush3.bf16.msra.mxu0 %v839_v48 }
 0x1f6   :  { %841 = vmatprep.subr.bf16.mxu0 %v912_v1 }
 0x1f9   :  { %843 = vmatpush3.bf16.msra.mxu0 %v842_v51 }
 0x2ac   :  { %v312_v39 = vpop.f32.mrb[2].mxu0 }
 0x2ad   :  { %v313_v40 = vadd.f32 %v529_v38, %v312_v39  ;;  %v677_v41 = vpop.f32.mrb[3].mxu0 }
 0x2af   :  { %855 = vtanh.f32 %v313_v40 }
 0x2b9   :  { %v856_v42 = vpop.eup %855 }
 0x2ba   :  { %711 = vmatmul.mubr.f32.vlgmr.msra.gmra.mrb[2].mxu1 %v856_v42 }
 0x38d   :  { %v408_v53 = vpop.f32.mrb[2].mxu1 }
 0x38e   :  { %v409_v54 = vadd.f32 %v531_v52, %v408_v53  ;;  %v712_v55 = vpop.f32.mrb[3].mxu1 }
 0x390   :  { %857 = vtanh.f32 %v409_v54 }
 0x39a   :  { %v858_v56 = vpop.eup %857 }
 0x39b   :  { %746 = vmatmul.mubr.f32.vlgmr.msra.gmra.mrb[4].mxu0 %v858_v56 }
 0x46e   :  { %v502_v58 = vpop.f32.mrb[4].mxu0 }
 0x46f   :  { %v503_v1 = vadd.f32 %v532_v57, %v502_v58  ;;  %v747_v59 = vpop.f32.mrb[5].mxu0 }
 0x471   :  { %507 = vst.msk [vmem:[#allocation5] sm:$0xff] %vm506_vm3, %v503_v1 }
 0x472   :  { %892 = shalt.err (!%p889_p12)
}
 0x473   :  { %s893_s30 = scalar_lea.hbm %s1091_s6, 128 }
 0x474   :  { %p894_p13 = scmp.ne.s32.totalorder %s1091_s6, %s893_s30  ;;  %p897_p0 = scmp.lt.u32.totalorder %s893_s30, %s1091_s6 }
 0x476   :  { %p899_p1 = pnand %p897_p0, %p894_p13 }
 0x478   :  { %902 = shalt.err (!%p899_p1)
}
 0x479   :  { %517 = dma.vmem_to_hbm [thread:$0]  %s515_s27, 128, %s1091_s6, [#allocation4]  }
 0x47a   :  { %905 = dma.done.wait [#allocation4], 128  }
 0x47b   :  { %906 = vsyncadd [#allocation4], 4294967168 }
 0x47c   :  { %521 = vsyncpa [#allocation3], 1 }
 0x47d   :  { %522 = vsyncpa [#allocation4], 1 }

</bundles_post_ra>
